<compile_context>
chip_gen: v6e
topology: v6e:2x2x1
jax: 0.10.0
libtpu: 0.0.40
codegen_flags: <defaults>
</compile_context>

<pallas_src>
from functools import partial

import numpy as np
import jax
import jax.numpy as jnp
from jax import lax
from jax.experimental import pallas as pl
from jax.experimental.pallas import tpu as pltpu  # noqa: F401  (imported per template)


# ----------------------------------------------------------------------------
# Architecture constants (canonical small GAN discriminator)
# ----------------------------------------------------------------------------
C_IN, H_IN, W_IN = 4, 16, 16
C1, C2 = 8, 16
KH = KW = 3
STRIDE, PAD = 2, 1
H1 = W1 = (H_IN + 2 * PAD - KH) // STRIDE + 1     # 8
H2 = W2 = (H1 + 2 * PAD - KH) // STRIDE + 1       # 4
FLAT = C2 * H2 * W2                               # 256
OUT_LANES = 128                                   # lane-dense output tile


# ----------------------------------------------------------------------------
# Single fused Pallas kernel: conv1 + conv2 + flatten + linear + sigmoid
# ----------------------------------------------------------------------------
def _fused_forward_kernel(x_ref, r1_ref, m1_ref, b1_ref,
                          r2_ref, m2_ref, b2_ref,
                          w3_ref, s_ref, b3_ref, o_ref):
    """Layouts (2-D so (rows, cols) = (sublane, lane)):
         x  : [B*H, W*C]   rows=(b,h), cols=(w,c)
       conv : Y = sum_di R_di @ X @ M_di  (stride-2, pad-1 conv folded into the
              constant R/M matrices), then bias + LeakyReLU, all on-chip.
       head : pre-permuted weight tile * Y2, per-batch row aggregation, lane
              reduction, stable sigmoid; lane-dense [B, 128] store.
    """
    f32 = jnp.float32
    x = x_ref[...]                                        # bf16 [B*16, 64]

    # ---- conv1: 4 -> 8 channels, 16x16 -> 8x8 (stride 2, pad 1) -------------
    n1 = r1_ref.shape[1]                                  # B*H1
    y1 = jnp.zeros((n1, W1 * C1), f32)
    for di in range(KH):                                  # static unroll (3)
        a = jnp.dot(r1_ref[di], x, preferred_element_type=f32)         # [B*H1, W*C]
        y1 = y1 + jnp.dot(a.astype(jnp.bfloat16), m1_ref[di],
                          preferred_element_type=f32)                  # [B*H1, W1*C1]
    y1 = y1 + b1_ref[...]                                 # bias row [1, W1*C1]
    y1 = jnp.where(y1 > 0, y1, 0.2 * y1)                  # LeakyReLU(0.2), f32
    x2 = y1.astype(jnp.bfloat16)

    # ---- conv2: 8 -> 16 channels, 8x8 -> 4x4 (stride 2, pad 1) --------------
    n2 = r2_ref.shape[1]                                  # B*H2
    y2 = jnp.zeros((n2, W2 * C2), f32)
    for di in range(KH):
        a = jnp.dot(r2_ref[di], x2, preferred_element_type=f32)        # [B*H2, W1*C1]
        y2 = y2 + jnp.dot(a.astype(jnp.bfloat16), m2_ref[di],
                          preferred_element_type=f32)                  # [B*H2, W2*C2]
    y2 = y2 + b2_ref[...]
    y2 = jnp.where(y2 > 0, y2, 0.2 * y2)

    # ---- flatten(NCHW) + Linear(256 -> 1) + sigmoid --------------------------
    # The NCHW flatten permutation is pre-folded into w3_ref [B*H2, W2*C2].
    t = y2 * w3_ref[...]                                  # f32 elementwise
    per_batch = jnp.dot(s_ref[...], t, preferred_element_type=f32)     # [B, W2*C2]
    logit = jnp.sum(per_batch, axis=1, keepdims=True) + b3_ref[...]    # [B, 1]

    # Numerically stable sigmoid: exp on EUP + approximate reciprocal on EUP.
    e = jnp.exp(-jnp.abs(logit))
    inv = pl.reciprocal(1.0 + e, approx=True)
    val = jnp.where(logit >= 0, inv, e * inv)             # in (0, 1)

    # Lane-dense store: broadcast over 128 lanes; wrapper keeps column 0.
    o_ref[...] = jnp.broadcast_to(val, o_ref.shape).astype(o_ref.dtype)


# ----------------------------------------------------------------------------
# Deterministic synthetic parameters (no checkpoint)
# ----------------------------------------------------------------------------
def init_params(key):
    k1, k2, k3, k4, k5, k6 = jax.random.split(key, 6)
    return {
        # conv weights in HWIO layout [kh, kw, Cin, Cout]  (== PyTorch Conv2d
        # weight [Cout, Cin, kh, kw] transposed).
        "w1": jax.random.normal(k1, (KH, KW, C_IN, C1), jnp.float32) * 0.1,
        "b1": jax.random.normal(k4, (C1,), jnp.float32) * 0.1,
        "w2": jax.random.normal(k2, (KH, KW, C1, C2), jnp.float32) * 0.1,
        "b2": jax.random.normal(k5, (C2,), jnp.float32) * 0.1,
        # linear weight in PyTorch flatten order (index = c*H2*W2 + h*W2 + w).
        "w3": jax.random.normal(k3, (FLAT,), jnp.float32) * 0.1,
        "b3": jax.random.normal(k6, (), jnp.float32) * 0.1,
    }


# ----------------------------------------------------------------------------
# Fold conv striding / zero-padding / flatten permutation into constants
# (numpy, once, at init time — zero runtime cost)
# ----------------------------------------------------------------------------
def _row_select(batch, h_in, oh, di):
    """R_di[(b,oh), (b,h)] = 1  iff  h == stride*oh + di - pad (in range)."""
    r = np.zeros((batch * oh, batch * h_in), np.float32)
    for b in range(batch):
        for o in range(oh):
            h = STRIDE * o + di - PAD
            if 0 <= h < h_in:
                r[b * oh + o, b * h_in + h] = 1.0
    return r


def _col_weight(w_in, c_in, ow, c_out, w_di):
    """M_di[(w,ci), (ow,co)] = weight[di, dj, ci, co] with dj = w - stride*ow + pad."""
    m = np.zeros((w_in * c_in, ow * c_out), np.float32)
    for w in range(w_in):
        for o in range(ow):
            dj = w - STRIDE * o + PAD
            if 0 <= dj < KW:
                m[w * c_in:(w + 1) * c_in, o * c_out:(o + 1) * c_out] = w_di[dj]
    return m


def build_operands(params, batch):
    w1 = np.asarray(params["w1"])
    w2 = np.asarray(params["w2"])
    w3 = np.asarray(params["w3"])

    r1 = np.stack([_row_select(batch, H_IN, H1, di) for di in range(KH)])
    m1 = np.stack([_col_weight(W_IN, C_IN, W1, C1, w1[di]) for di in range(KH)])
    r2 = np.stack([_row_select(batch, H1, H2, di) for di in range(KH)])
    m2 = np.stack([_col_weight(W1, C1, W2, C2, w2[di]) for di in range(KH)])

    # conv biases broadcast over the (ow, c) column layout.
    b1_row = np.tile(np.asarray(params["b1"]), W1)[None, :]      # [1, W1*C1]
    b2_row = np.tile(np.asarray(params["b2"]), W2)[None, :]      # [1, W2*C2]

    # Linear weight: fold the PyTorch NCHW flatten permutation into a tile laid
    # out as [(b,h) rows, (w,c) cols] — removes the runtime transpose.
    w3m = np.zeros((H2, W2 * C2), np.float32)
    for c in range(C2):
        for h in range(H2):
            for w in range(W2):
                w3m[h, w * C2 + c] = w3[c * H2 * W2 + h * W2 + w]
    w3_tile = np.tile(w3m, (batch, 1))                           # [B*H2, W2*C2]

    # Per-batch row aggregation for the linear layer.
    s = np.zeros((batch, batch * H2), np.float32)
    for b in range(batch):
        s[b, b * H2:(b + 1) * H2] = 1.0

    bf16, f32 = jnp.bfloat16, jnp.float32
    return {
        "r1": jnp.asarray(r1, bf16), "m1": jnp.asarray(m1, bf16),
        "b1": jnp.asarray(b1_row, f32),
        "r2": jnp.asarray(r2, bf16), "m2": jnp.asarray(m2, bf16),
        "b2": jnp.asarray(b2_row, f32),
        "w3": jnp.asarray(w3_tile, f32), "s": jnp.asarray(s, f32),
        "b3": jnp.asarray(params["b3"], f32).reshape(1, 1),
    }


# ----------------------------------------------------------------------------
# Discriminator forward (single pallas_call)
# ----------------------------------------------------------------------------
def discriminator_forward(operands, images_nchw):
    """images: [B, C, H, W] (PyTorch NCHW) -> validity [B, 1] in (0, 1)."""
    b = images_nchw.shape[0]
    # NCHW -> rows=(b,h), cols=(w,c); bf16 operands for MXU-native matmuls.
    x2d = (jnp.transpose(images_nchw, (0, 2, 3, 1))
           .reshape(b * H_IN, W_IN * C_IN).astype(jnp.bfloat16))

    out = pl.pallas_call(
        _fused_forward_kernel,
        out_shape=jax.ShapeDtypeStruct((b, OUT_LANES), jnp.float32),
        # Tiny problem: single grid point; every operand is a full VMEM block
        # (<120 KB total), so no BlockSpec tiling is needed.
        # TODO(synk): if batch is ever scaled up, add a grid over the (b,h) row
        # axis with dimension_semantics=("parallel",) to use v7x's 2 TCs and
        # retile for its 64 MiB VMEM.
    )(x2d, operands["r1"], operands["m1"], operands["b1"],
      operands["r2"], operands["m2"], operands["b2"],
      operands["w3"], operands["s"], operands["b3"])
    return out[:, :1]                                   # lane-dense tile -> [B, 1]


# ----------------------------------------------------------------------------
# Pure-JAX reference of the same network (correctness check)
# ----------------------------------------------------------------------------
def reference_forward(params, images_nchw):
    dn = ("NCHW", "HWIO", "NCHW")
    x = lax.conv_general_dilated(images_nchw, params["w1"], (STRIDE, STRIDE),
                                 ((PAD, PAD), (PAD, PAD)), dimension_numbers=dn)
    x = x + params["b1"][None, :, None, None]
    x = jnp.where(x > 0, x, 0.2 * x)
    x = lax.conv_general_dilated(x, params["w2"], (STRIDE, STRIDE),
                                 ((PAD, PAD), (PAD, PAD)), dimension_numbers=dn)
    x = x + params["b2"][None, :, None, None]
    x = jnp.where(x > 0, x, 0.2 * x)
    flat = x.reshape(x.shape[0], -1)                     # PyTorch NCHW flatten
    logits = flat @ params["w3"][:, None] + params["b3"]
    return jax.nn.sigmoid(logits)


if __name__ == "__main__":
    key = jax.random.PRNGKey(0)
    k_params, k_input = jax.random.split(key)

    params = init_params(k_params)
    images = jax.random.normal(k_input, (2, C_IN, H_IN, W_IN), jnp.float32)  # NCHW

    operands = build_operands(params, batch=2)
    fwd = jax.jit(discriminator_forward)
    validity = jax.block_until_ready(fwd(operands, images))

    assert validity.shape == (2, 1)
    assert bool(jnp.all((validity > 0.0) & (validity < 1.0)))

    # Check the fused bf16 Pallas kernel against the f32 XLA reference.
    ref = jax.block_until_ready(reference_forward(params, images))
    assert bool(jnp.allclose(validity, ref, atol=2e-2, rtol=2e-2)), (validity, ref)

    print("KERNEL_OK")
</pallas_src>

<mosaic_0001>
module attributes {stable_mosaic.version = 11 : i64} {
  func.func @_fused_forward_kernel(%arg0: memref<32x64xbf16, #tpu.memory_space<vmem>>, %arg1: memref<3x16x32xbf16, #tpu.memory_space<vmem>>, %arg2: memref<3x64x64xbf16, #tpu.memory_space<vmem>>, %arg3: memref<1x64xf32, #tpu.memory_space<vmem>>, %arg4: memref<3x8x16xbf16, #tpu.memory_space<vmem>>, %arg5: memref<3x64x64xbf16, #tpu.memory_space<vmem>>, %arg6: memref<1x64xf32, #tpu.memory_space<vmem>>, %arg7: memref<8x64xf32, #tpu.memory_space<vmem>>, %arg8: memref<2x8xf32, #tpu.memory_space<vmem>>, %arg9: memref<1x1xf32, #tpu.memory_space<vmem>>, %arg10: memref<2x128xf32, #tpu.memory_space<vmem>>) attributes {dimension_semantics = [], scalar_prefetch = 0 : i64, scratch_operands = 0 : i64, tpu.core_type = #tpu.core_type<tc>} {
    %c0 = arith.constant 0 : index
    %c0_0 = arith.constant 0 : index
    %0 = vector.load %arg0[%c0, %c0_0] : memref<32x64xbf16, #tpu.memory_space<vmem>>, vector<32x64xbf16>
    %cst = arith.constant 0.000000e+00 : f32
    %1 = vector.broadcast %cst : f32 to vector<16x64xf32>
    %c0_1 = arith.constant 0 : index
    %c0_2 = arith.constant 0 : index
    %c0_3 = arith.constant 0 : index
    %2 = vector.load %arg1[%c0_1, %c0_2, %c0_3] : memref<3x16x32xbf16, #tpu.memory_space<vmem>>, vector<1x16x32xbf16>
    %3 = vector.shape_cast %2 : vector<1x16x32xbf16> to vector<16x32xbf16>
    %cst_4 = arith.constant dense<0.000000e+00> : vector<16x64xf32>
    %4 = tpu.matmul %3, %0, %cst_4 {dimension_numbers = #tpu.dot_dimension_numbers<[1], [0], [0], [1], [0, 0, 1, 1], [], []>} : vector<16x32xbf16>, vector<32x64xbf16>, vector<16x64xf32> -> vector<16x64xf32>
    %5 = arith.truncf %4 : vector<16x64xf32> to vector<16x64xbf16>
    %c0_5 = arith.constant 0 : index
    %c0_6 = arith.constant 0 : index
    %c0_7 = arith.constant 0 : index
    %6 = vector.load %arg2[%c0_5, %c0_6, %c0_7] : memref<3x64x64xbf16, #tpu.memory_space<vmem>>, vector<1x64x64xbf16>
    %7 = vector.shape_cast %6 : vector<1x64x64xbf16> to vector<64x64xbf16>
    %cst_8 = arith.constant dense<0.000000e+00> : vector<16x64xf32>
    %8 = tpu.matmul %5, %7, %cst_8 {dimension_numbers = #tpu.dot_dimension_numbers<[1], [0], [0], [1], [0, 0, 1, 1], [], []>} : vector<16x64xbf16>, vector<64x64xbf16>, vector<16x64xf32> -> vector<16x64xf32>
    %9 = arith.addf %1, %8 : vector<16x64xf32>
    %c1 = arith.constant 1 : index
    %c0_9 = arith.constant 0 : index
    %c0_10 = arith.constant 0 : index
    %10 = vector.load %arg1[%c1, %c0_9, %c0_10] : memref<3x16x32xbf16, #tpu.memory_space<vmem>>, vector<1x16x32xbf16>
    %11 = vector.shape_cast %10 : vector<1x16x32xbf16> to vector<16x32xbf16>
    %cst_11 = arith.constant dense<0.000000e+00> : vector<16x64xf32>
    %12 = tpu.matmul %11, %0, %cst_11 {dimension_numbers = #tpu.dot_dimension_numbers<[1], [0], [0], [1], [0, 0, 1, 1], [], []>} : vector<16x32xbf16>, vector<32x64xbf16>, vector<16x64xf32> -> vector<16x64xf32>
    %13 = arith.truncf %12 : vector<16x64xf32> to vector<16x64xbf16>
    %c1_12 = arith.constant 1 : index
    %c0_13 = arith.constant 0 : index
    %c0_14 = arith.constant 0 : index
    %14 = vector.load %arg2[%c1_12, %c0_13, %c0_14] : memref<3x64x64xbf16, #tpu.memory_space<vmem>>, vector<1x64x64xbf16>
    %15 = vector.shape_cast %14 : vector<1x64x64xbf16> to vector<64x64xbf16>
    %cst_15 = arith.constant dense<0.000000e+00> : vector<16x64xf32>
    %16 = tpu.matmul %13, %15, %cst_15 {dimension_numbers = #tpu.dot_dimension_numbers<[1], [0], [0], [1], [0, 0, 1, 1], [], []>} : vector<16x64xbf16>, vector<64x64xbf16>, vector<16x64xf32> -> vector<16x64xf32>
    %17 = arith.addf %9, %16 : vector<16x64xf32>
    %c2 = arith.constant 2 : index
    %c0_16 = arith.constant 0 : index
    %c0_17 = arith.constant 0 : index
    %18 = vector.load %arg1[%c2, %c0_16, %c0_17] : memref<3x16x32xbf16, #tpu.memory_space<vmem>>, vector<1x16x32xbf16>
    %19 = vector.shape_cast %18 : vector<1x16x32xbf16> to vector<16x32xbf16>
    %cst_18 = arith.constant dense<0.000000e+00> : vector<16x64xf32>
    %20 = tpu.matmul %19, %0, %cst_18 {dimension_numbers = #tpu.dot_dimension_numbers<[1], [0], [0], [1], [0, 0, 1, 1], [], []>} : vector<16x32xbf16>, vector<32x64xbf16>, vector<16x64xf32> -> vector<16x64xf32>
    %21 = arith.truncf %20 : vector<16x64xf32> to vector<16x64xbf16>
    %c2_19 = arith.constant 2 : index
    %c0_20 = arith.constant 0 : index
    %c0_21 = arith.constant 0 : index
    %22 = vector.load %arg2[%c2_19, %c0_20, %c0_21] : memref<3x64x64xbf16, #tpu.memory_space<vmem>>, vector<1x64x64xbf16>
    %23 = vector.shape_cast %22 : vector<1x64x64xbf16> to vector<64x64xbf16>
    %cst_22 = arith.constant dense<0.000000e+00> : vector<16x64xf32>
    %24 = tpu.matmul %21, %23, %cst_22 {dimension_numbers = #tpu.dot_dimension_numbers<[1], [0], [0], [1], [0, 0, 1, 1], [], []>} : vector<16x64xbf16>, vector<64x64xbf16>, vector<16x64xf32> -> vector<16x64xf32>
    %25 = arith.addf %17, %24 : vector<16x64xf32>
    %c0_23 = arith.constant 0 : index
    %c0_24 = arith.constant 0 : index
    %26 = vector.load %arg3[%c0_23, %c0_24] : memref<1x64xf32, #tpu.memory_space<vmem>>, vector<1x64xf32>
    %27 = vector.broadcast %26 : vector<1x64xf32> to vector<16x64xf32>
    %28 = arith.addf %25, %27 : vector<16x64xf32>
    %cst_25 = arith.constant 0.000000e+00 : f32
    %29 = vector.broadcast %cst_25 : f32 to vector<16x64xf32>
    %30 = arith.cmpf ogt, %28, %29 : vector<16x64xf32>
    %cst_26 = arith.constant 2.000000e-01 : f32
    %31 = vector.broadcast %cst_26 : f32 to vector<16x64xf32>
    %32 = arith.mulf %31, %28 : vector<16x64xf32>
    %33 = arith.select %30, %28, %32 : vector<16x64xi1>, vector<16x64xf32>
    %34 = arith.truncf %33 : vector<16x64xf32> to vector<16x64xbf16>
    %cst_27 = arith.constant 0.000000e+00 : f32
    %35 = vector.broadcast %cst_27 : f32 to vector<8x64xf32>
    %c0_28 = arith.constant 0 : index
    %c0_29 = arith.constant 0 : index
    %c0_30 = arith.constant 0 : index
    %36 = vector.load %arg4[%c0_28, %c0_29, %c0_30] : memref<3x8x16xbf16, #tpu.memory_space<vmem>>, vector<1x8x16xbf16>
    %37 = vector.shape_cast %36 : vector<1x8x16xbf16> to vector<8x16xbf16>
    %cst_31 = arith.constant dense<0.000000e+00> : vector<8x64xf32>
    %38 = tpu.matmul %37, %34, %cst_31 {dimension_numbers = #tpu.dot_dimension_numbers<[1], [0], [0], [1], [0, 0, 1, 1], [], []>} : vector<8x16xbf16>, vector<16x64xbf16>, vector<8x64xf32> -> vector<8x64xf32>
    %39 = arith.truncf %38 : vector<8x64xf32> to vector<8x64xbf16>
    %c0_32 = arith.constant 0 : index
    %c0_33 = arith.constant 0 : index
    %c0_34 = arith.constant 0 : index
    %40 = vector.load %arg5[%c0_32, %c0_33, %c0_34] : memref<3x64x64xbf16, #tpu.memory_space<vmem>>, vector<1x64x64xbf16>
    %41 = vector.shape_cast %40 : vector<1x64x64xbf16> to vector<64x64xbf16>
    %cst_35 = arith.constant dense<0.000000e+00> : vector<8x64xf32>
    %42 = tpu.matmul %39, %41, %cst_35 {dimension_numbers = #tpu.dot_dimension_numbers<[1], [0], [0], [1], [0, 0, 1, 1], [], []>} : vector<8x64xbf16>, vector<64x64xbf16>, vector<8x64xf32> -> vector<8x64xf32>
    %43 = arith.addf %35, %42 : vector<8x64xf32>
    %c1_36 = arith.constant 1 : index
    %c0_37 = arith.constant 0 : index
    %c0_38 = arith.constant 0 : index
    %44 = vector.load %arg4[%c1_36, %c0_37, %c0_38] : memref<3x8x16xbf16, #tpu.memory_space<vmem>>, vector<1x8x16xbf16>
    %45 = vector.shape_cast %44 : vector<1x8x16xbf16> to vector<8x16xbf16>
    %cst_39 = arith.constant dense<0.000000e+00> : vector<8x64xf32>
    %46 = tpu.matmul %45, %34, %cst_39 {dimension_numbers = #tpu.dot_dimension_numbers<[1], [0], [0], [1], [0, 0, 1, 1], [], []>} : vector<8x16xbf16>, vector<16x64xbf16>, vector<8x64xf32> -> vector<8x64xf32>
    %47 = arith.truncf %46 : vector<8x64xf32> to vector<8x64xbf16>
    %c1_40 = arith.constant 1 : index
    %c0_41 = arith.constant 0 : index
    %c0_42 = arith.constant 0 : index
    %48 = vector.load %arg5[%c1_40, %c0_41, %c0_42] : memref<3x64x64xbf16, #tpu.memory_space<vmem>>, vector<1x64x64xbf16>
    %49 = vector.shape_cast %48 : vector<1x64x64xbf16> to vector<64x64xbf16>
    %cst_43 = arith.constant dense<0.000000e+00> : vector<8x64xf32>
    %50 = tpu.matmul %47, %49, %cst_43 {dimension_numbers = #tpu.dot_dimension_numbers<[1], [0], [0], [1], [0, 0, 1, 1], [], []>} : vector<8x64xbf16>, vector<64x64xbf16>, vector<8x64xf32> -> vector<8x64xf32>
    %51 = arith.addf %43, %50 : vector<8x64xf32>
    %c2_44 = arith.constant 2 : index
    %c0_45 = arith.constant 0 : index
    %c0_46 = arith.constant 0 : index
    %52 = vector.load %arg4[%c2_44, %c0_45, %c0_46] : memref<3x8x16xbf16, #tpu.memory_space<vmem>>, vector<1x8x16xbf16>
    %53 = vector.shape_cast %52 : vector<1x8x16xbf16> to vector<8x16xbf16>
    %cst_47 = arith.constant dense<0.000000e+00> : vector<8x64xf32>
    %54 = tpu.matmul %53, %34, %cst_47 {dimension_numbers = #tpu.dot_dimension_numbers<[1], [0], [0], [1], [0, 0, 1, 1], [], []>} : vector<8x16xbf16>, vector<16x64xbf16>, vector<8x64xf32> -> vector<8x64xf32>
    %55 = arith.truncf %54 : vector<8x64xf32> to vector<8x64xbf16>
    %c2_48 = arith.constant 2 : index
    %c0_49 = arith.constant 0 : index
    %c0_50 = arith.constant 0 : index
    %56 = vector.load %arg5[%c2_48, %c0_49, %c0_50] : memref<3x64x64xbf16, #tpu.memory_space<vmem>>, vector<1x64x64xbf16>
    %57 = vector.shape_cast %56 : vector<1x64x64xbf16> to vector<64x64xbf16>
    %cst_51 = arith.constant dense<0.000000e+00> : vector<8x64xf32>
    %58 = tpu.matmul %55, %57, %cst_51 {dimension_numbers = #tpu.dot_dimension_numbers<[1], [0], [0], [1], [0, 0, 1, 1], [], []>} : vector<8x64xbf16>, vector<64x64xbf16>, vector<8x64xf32> -> vector<8x64xf32>
    %59 = arith.addf %51, %58 : vector<8x64xf32>
    %c0_52 = arith.constant 0 : index
    %c0_53 = arith.constant 0 : index
    %60 = vector.load %arg6[%c0_52, %c0_53] : memref<1x64xf32, #tpu.memory_space<vmem>>, vector<1x64xf32>
    %61 = vector.broadcast %60 : vector<1x64xf32> to vector<8x64xf32>
    %62 = arith.addf %59, %61 : vector<8x64xf32>
    %cst_54 = arith.constant 0.000000e+00 : f32
    %63 = vector.broadcast %cst_54 : f32 to vector<8x64xf32>
    %64 = arith.cmpf ogt, %62, %63 : vector<8x64xf32>
    %cst_55 = arith.constant 2.000000e-01 : f32
    %65 = vector.broadcast %cst_55 : f32 to vector<8x64xf32>
    %66 = arith.mulf %65, %62 : vector<8x64xf32>
    %67 = arith.select %64, %62, %66 : vector<8x64xi1>, vector<8x64xf32>
    %c0_56 = arith.constant 0 : index
    %c0_57 = arith.constant 0 : index
    %68 = vector.load %arg7[%c0_56, %c0_57] : memref<8x64xf32, #tpu.memory_space<vmem>>, vector<8x64xf32>
    %69 = arith.mulf %67, %68 : vector<8x64xf32>
    %c0_58 = arith.constant 0 : index
    %c0_59 = arith.constant 0 : index
    %70 = vector.load %arg8[%c0_58, %c0_59] : memref<2x8xf32, #tpu.memory_space<vmem>>, vector<2x8xf32>
    %cst_60 = arith.constant dense<0.000000e+00> : vector<2x64xf32>
    %71 = tpu.matmul %70, %69, %cst_60 {dimension_numbers = #tpu.dot_dimension_numbers<[1], [0], [0], [1], [0, 0, 1, 1], [], []>} : vector<2x8xf32>, vector<8x64xf32>, vector<2x64xf32> -> vector<2x64xf32>
    %cst_61 = arith.constant dense<0.000000e+00> : vector<2xf32>
    %72 = vector.multi_reduction <add>, %71, %cst_61 [1] : vector<2x64xf32> to vector<2xf32>
    %73 = vector.shape_cast %72 : vector<2xf32> to vector<2x1xf32>
    %c0_62 = arith.constant 0 : index
    %c0_63 = arith.constant 0 : index
    %74 = vector.load %arg9[%c0_62, %c0_63] : memref<1x1xf32, #tpu.memory_space<vmem>>, vector<1x1xf32>
    %75 = vector.broadcast %74 : vector<1x1xf32> to vector<2x1xf32>
    %76 = arith.addf %73, %75 : vector<2x1xf32>
    %77 = math.absf %76 : vector<2x1xf32>
    %cst_64 = arith.constant 0.000000e+00 : f32
    %78 = vector.broadcast %cst_64 : f32 to vector<2x1xf32>
    %79 = arith.subf %78, %77 : vector<2x1xf32>
    %80 = math.exp %79 : vector<2x1xf32>
    %cst_65 = arith.constant 1.000000e+00 : f32
    %81 = vector.broadcast %cst_65 : f32 to vector<2x1xf32>
    %82 = arith.addf %81, %80 : vector<2x1xf32>
    %83 = tpu.reciprocal %82 {approx = true} : vector<2x1xf32> -> vector<2x1xf32>
    %cst_66 = arith.constant 0.000000e+00 : f32
    %84 = vector.broadcast %cst_66 : f32 to vector<2x1xf32>
    %85 = arith.cmpf oge, %76, %84 : vector<2x1xf32>
    %86 = arith.mulf %80, %83 : vector<2x1xf32>
    %87 = arith.select %85, %83, %86 : vector<2x1xi1>, vector<2x1xf32>
    %88 = vector.shape_cast %87 : vector<2x1xf32> to vector<2x1xf32>
    %89 = vector.broadcast %88 : vector<2x1xf32> to vector<2x128xf32>
    %c0_67 = arith.constant 0 : index
    %c0_68 = arith.constant 0 : index
    %90 = vector.load %arg10[%c0_67, %c0_68] : memref<2x128xf32, #tpu.memory_space<vmem>>, vector<2x128xf32>
    tpu.vector_store %arg10[%c0_67, %c0_68], %89 {strides = array<i32>} : memref<2x128xf32, #tpu.memory_space<vmem>>, vector<2x128xf32>,
    return
  }
}

</mosaic_0001>

<bundles_post_ra>
// kernel: discriminator_forward.1
= control target key start
LH: loop header
LB: loop body
LE: loop exit
PB: predicated region body
PF: predicated region fallthrough
CT: control target
= control target key end

     0   :  { %v1233_v0 = vmov 0.0   ;;  %vm1234_vm0 = vmmov 0   ;;  %vm61_vm1 = vcmask 261120   ;;  %vm201_vm2 = vcmask 523264   ;;  %s1477_s0 = inlined_call_operand.vmem [shape: bf16[32,64], index: 0, kind: input, shape index: {}]   ;;  %s1478_s1 = inlined_call_operand.vmem [shape: bf16[3,16,32], index: 1, kind: input, shape index: {}]   ;;  %s1479_s2 = inlined_call_operand.vmem [shape: bf16[3,64,64], index: 2, kind: input, shape index: {}]   ;;  %s1480_s5 = inlined_call_operand.vmem [shape: bf16[3,64,64], index: 5, kind: input, shape index: {}]   ;;  %s1481_s3 = inlined_call_operand.vmem [shape: f32[1,64], index: 3, kind: input, shape index: {}]   ;;  %s1482_s4 = inlined_call_operand.vmem [shape: bf16[3,8,16], index: 4, kind: input, shape index: {}]   ;;  %s1483_s6 = inlined_call_operand.vmem [shape: f32[1,64], index: 6, kind: input, shape index: {}]   ;;  %s1484_s7 = inlined_call_operand.vmem [shape: f32[8,64], index: 7, kind: input, shape index: {}]   ;;  %s1485_s8 = inlined_call_operand.vmem [shape: f32[2,8], index: 8, kind: input, shape index: {}]   ;;  %s1486_s9 = inlined_call_operand.<no memory space> [shape: f32[1,1], index: 9, kind: input, shape index: {}]   ;;  %s1487_s10 = inlined_call_operand.vmem [shape: f32[2,128], index: 10, kind: output, shape index: {}]  }
   0x1   :  { %1077 = vmatprep.subr.bf16.mxu1 %v1233_v0  ;;  %v1200_v1 = vld [vmem:[%s1477_s0 + $0x8] sm:$0xff]   ;;  %1081 = vmatprep.mubr.msk.bf16.mxu1 %vm1234_vm0, %v1233_v0  ;;  %v1201_v2 = vld [vmem:[%s1477_s0] sm:$0xff]   ;;  %v1204_v5 = vld [vmem:[%s1479_s2 + $0x18] sm:$0xff]   ;;  %vm463_vm5 = vcmask 130048   ;;  %vm842_vm7 = vcmask 64512   ;;  %vm916_vm8 = vcmask 517120  }
   0x2   :  { %1093 = vmatprep.subr.bf16.mxu0 %v1233_v0  ;;  %1101 = vmatprep.mubr.msk.bf16.mxu0 %vm1234_vm0, %v1233_v0  ;;  %v1202_v3 = vld [vmem:[%s1478_s1] sm:$0xff]   ;;  %v1203_v4 = vld [vmem:[%s1478_s1 + $0x8] sm:$0xff]   ;;  %v1205_v6 = vld [vmem:[%s1479_s2 + $0x10] sm:$0xff]  }
   0x3   :  { %1078 = vmatpush3.bf16.msra.mxu1 %v1200_v1  ;;  %v1206_v7 = vld [vmem:[%s1479_s2 + $0x38] sm:$0xff]   ;;  %v1207_v8 = vld [vmem:[%s1479_s2 + $0x8] sm:$0xff]   ;;  %v1208_v9 = vld [vmem:[%s1479_s2 + $0x30] sm:$0xff]  }
   0x4   :  { %1079 = vmatprep.subr.bf16.mxu1 %v1233_v0  ;;  %1094 = vmatpush3.bf16.msra.mxu0 %v1206_v7  ;;  %v1209_v10 = vld [vmem:[%s1479_s2] sm:$0xff]   ;;  %v1210_v11 = vld [vmem:[%s1479_s2 + $0x28] sm:$0xff]   ;;  %v1212_v23 = vld [vmem:[%s1478_s1 + $0x10] sm:$0xff]  }
   0x5   :  { %1095 = vmatprep.subr.bf16.mxu0 %v1233_v0  ;;  %v1211_v12 = vld [vmem:[%s1479_s2 + $0x20] sm:$0xff]   ;;  %v1213_v24 = vld [vmem:[%s1479_s2 + $0x58] sm:$0xff]   ;;  %v1214_v25 = vld [vmem:[%s1479_s2 + $0x50] sm:$0xff]  }
   0x6   :  { %v1215_v26 = vld [vmem:[%s1479_s2 + $0x48] sm:$0xff]   ;;  %v1216_v27 = vld [vmem:[%s1479_s2 + $0x40] sm:$0xff]   ;;  %v1219_v43 = vld [vmem:[%s1480_s5 + $0x38] sm:$0xff]  }
   0x7   :  { %1080 = vmatpush3.bf16.msra.mxu1 %v1201_v2  ;;  %v1221_v44 = vld [vmem:[%s1480_s5 + $0x30] sm:$0xff]   ;;  %v990_v46 = vld [vmem:[%s1481_s3] ss:$0 sm:$0xff]  ;;  %v992_v60 = vld [vmem:[%s1482_s4 + $0x4] sm:$0xf] }
   0x8   :  { %1085 = vmatprep.subr.bf16.mxu1 %v1233_v0  ;;  %1096 = vmatpush3.bf16.msra.mxu0 %v1208_v9  ;;  %v462_v59 = vld [vmem:[%s1482_s4] sm:$0xf]  ;;  %v1217_v61 = vld [vmem:[%s1480_s5 + $0x18] sm:$0xff]   ;;  %v1218_v62 = vld [vmem:[%s1480_s5 + $0x10] sm:$0xff]  }
   0x9   :  { %1097 = vmatprep.subr.bf16.mxu0 %v1233_v0  ;;  %v1220_v63 = vld [vmem:[%s1480_s5 + $0x8] sm:$0xff]  }
   0xa   :  { %1082 = vmatmul.mubr.msk.bf16.vlgmr.msra.gmra.mxu1 %vm61_vm1, %v1202_v3  ;;  %v1224_v3 = vld [vmem:[%s1480_s5 + $0x20] sm:$0xff]  }
   0xb   :  { %1086 = vmatpush3.bf16.msra.mxu1 %v1200_v1  ;;  %1089 = vmatprep.mubr.msk.bf16.mxu1 %vm1234_vm0, %v1233_v0 }
   0xc   :  { %1087 = vmatprep.subr.bf16.mxu1 %v1233_v0  ;;  %1098 = vmatpush3.bf16.msra.mxu0 %v1210_v11 }
   0xd   :  { %1099 = vmatprep.subr.bf16.mxu0 %v1233_v0 }
   0xf   :  { %1088 = vmatpush3.bf16.msra.mxu1 %v1201_v2 }
  0x10   :  { %1105 = vmatprep.subr.bf16.mxu1 %v1233_v0  ;;  %1100 = vmatpush3.bf16.msra.mxu0 %v1211_v12 }
  0x11   :  { %1117 = vmatprep.subr.bf16.mxu0 %v1233_v0 }
  0x12   :  { %1090 = vmatmul.mubr.msk.bf16.vlgmr.msra.gmra.mxu1 %vm61_vm1, %v1203_v4 }
  0x13   :  { %1106 = vmatpush3.bf16.msra.mxu1 %v1204_v5  ;;  %1113 = vmatprep.mubr.msk.bf16.mxu1 %vm1234_vm0, %v1233_v0 }
  0x14   :  { %1107 = vmatprep.subr.bf16.mxu1 %v1233_v0 }
  0x17   :  { %1108 = vmatpush3.bf16.msra.mxu1 %v1205_v6 }
  0x18   :  { %1109 = vmatprep.subr.bf16.mxu1 %v1233_v0 }
  0x1b   :  { %1110 = vmatpush3.bf16.msra.mxu1 %v1207_v8 }
  0x1c   :  { %1111 = vmatprep.subr.bf16.mxu1 %v1233_v0 }
  0x1f   :  { %1112 = vmatpush3.bf16.msra.mxu1 %v1209_v10 }
  0x20   :  { %1125 = vmatprep.subr.bf16.mxu1 %v1233_v0 }
  0xca   :  { %v99_v13 = vpop.f32.mrf.mxu1 }
  0xcc   :  { %v1083_v14 = vpop.f32.mrf.mxu1 }
  0xcd   :  { %v1012_v14 = vld [vmem:[%s1482_s4 + $0x8] sm:$0xf] }
  0xce   :  { %v102_v15 = vpop.f32.mrf.mxu1 }
  0xcf   :  { %v106_v16 = vpack.c.bf16 %v102_v15, %v99_v13  ;;  %v1225_v15 = vld [vmem:[%s1480_s5 + $0x58] sm:$0xff]  }
  0xd0   :  { %v1084_v17 = vpop.f32.mrf.mxu1 }
  0xd1   :  { %1114 = vmatmul.mubr.msk.bf16.vlgmr.msra.gmra.mxu1 %vm201_vm2, %v106_v16  ;;  %v1226_v16 = vld [vmem:[%s1480_s5 + $0x50] sm:$0xff]   ;;  %v1227_v17 = vld [vmem:[%s1480_s5 + $0x48] sm:$0xff]  }
  0xd2   :  { %v160_v18 = vpop.f32.mrf.mxu1  ;;  %1133 = vmatprep.mubr.msk.bf16.mxu1 %vm1234_vm0, %v1233_v0  ;;  %1126 = vmatpush3.bf16.msra.mxu1 %v1213_v24 }
  0xd3   :  { %1127 = vmatprep.subr.bf16.mxu1 %v1233_v0 }
  0xd4   :  { %v1091_v19 = vpop.f32.mrf.mxu1 }
  0xd6   :  { %v163_v20 = vpop.f32.mrf.mxu1  ;;  %1128 = vmatpush3.bf16.msra.mxu1 %v1214_v25 }
  0xd7   :  { %v167_v21 = vpack.c.bf16 %v163_v20, %v160_v18  ;;  %1129 = vmatprep.subr.bf16.mxu1 %v1233_v0  ;;  %v1228_v18 = vld [vmem:[%s1480_s5 + $0x40] sm:$0xff]  }
  0xd8   :  { %v1092_v22 = vpop.f32.mrf.mxu1 }
  0xd9   :  { %1102 = vmatmul.mubr.msk.bf16.vlgmr.msra.gmra.mxu0 %vm201_vm2, %v167_v21 }
  0xda   :  { %1118 = vmatpush3.bf16.msra.mxu0 %v1200_v1  ;;  %1121 = vmatprep.mubr.msk.bf16.mxu0 %vm1234_vm0, %v1233_v0  ;;  %v1222_v1 = vld [vmem:[%s1480_s5] sm:$0xff]  }
  0xdb   :  { %1119 = vmatprep.subr.bf16.mxu0 %v1233_v0  ;;  %1130 = vmatpush3.bf16.msra.mxu1 %v1215_v26 }
  0xdc   :  { %1131 = vmatprep.subr.bf16.mxu1 %v1233_v0 }
  0xde   :  { %1120 = vmatpush3.bf16.msra.mxu0 %v1201_v2  ;;  %v1223_v2 = vld [vmem:[%s1480_s5 + $0x28] sm:$0xff]  }
  0xdf   :  { %1137 = vmatprep.subr.bf16.mxu0 %v1233_v0  ;;  %1132 = vmatpush3.bf16.msra.mxu1 %v1216_v27 }
  0xe0   :  { %1149 = vmatprep.subr.bf16.mxu1 %v1233_v0 }
  0xe1   :  { %1122 = vmatmul.mubr.msk.bf16.vlgmr.msra.gmra.mxu0 %vm61_vm1, %v1212_v23 }
  0xe2   :  { %1139 = vmatprep.mubr.msk.bf16.mxu0 %vm1234_vm0, %v1233_v0 }
 0x191   :  { %v307_v28 = vpop.f32.mrf.mxu1 }
 0x193   :  { %v1115_v29 = vpop.f32.mrf.mxu1 }
 0x195   :  { %v310_v30 = vpop.f32.mrf.mxu1 }
 0x197   :  { %v1116_v31 = vpop.f32.mrf.mxu1 }
 0x199   :  { %v239_v32 = vpop.f32.mrf.mxu0 }
 0x19a   :  { %v308_v33 = vadd.f32 %v307_v28, %v239_v32 }
 0x19b   :  { %v1103_v34 = vpop.f32.mrf.mxu0 }
 0x19d   :  { %v242_v35 = vpop.f32.mrf.mxu0 }
 0x19e   :  { %v311_v36 = vadd.f32 %v310_v30, %v242_v35 }
 0x19f   :  { %v1104_v37 = vpop.f32.mrf.mxu0 }
 0x1a1   :  { %v359_v38 = vpop.f32.mrf.mxu0 }
 0x1a3   :  { %v1123_v39 = vpop.f32.mrf.mxu0 }
 0x1a4   :  { %v839_v39 = vld [vmem:[%s1484_s7] sm:$0xff] }
 0x1a5   :  { %v362_v40 = vpop.f32.mrf.mxu0 }
 0x1a6   :  { %v366_v41 = vpack.c.bf16 %v362_v40, %v359_v38 }
 0x1a7   :  { %v1124_v42 = vpop.f32.mrf.mxu0 }
 0x1a8   :  { %1134 = vmatmul.mubr.msk.bf16.vlgmr.msra.gmra.mxu1 %vm201_vm2, %v366_v41 }
 0x1a9   :  { %1157 = vmatprep.mubr.msk.bf16.mxu1 %vm1234_vm0, %v1233_v0  ;;  %1150 = vmatpush3.bf16.msra.mxu1 %v1219_v43  ;;  %v841_v43 = vld [vmem:[%s1485_s8] sm:$0x3] }
 0x1aa   :  { %1151 = vmatprep.subr.bf16.mxu1 %v1233_v0 }
 0x1ad   :  { %1152 = vmatpush3.bf16.msra.mxu1 %v1221_v44  ;;  %v15_v44 = vstv %s1486_s9 }
 0x1ae   :  { %1153 = vmatprep.subr.bf16.mxu1 %v1233_v0  ;;  %16 = vst [vmem:[#allocation2] sm:$0x1] %v15_v44 }
 0x1b1   :  { %1154 = vmatpush3.bf16.msra.mxu1 %v1223_v2 }
 0x1b2   :  { %1155 = vmatprep.subr.bf16.mxu1 %v1233_v0 }
 0x1b5   :  { %1156 = vmatpush3.bf16.msra.mxu1 %v1224_v3 }
 0x1b6   :  { %1173 = vmatprep.subr.bf16.mxu1 %v1233_v0 }
 0x268   :  { %v437_v45 = vpop.f32.mrf.mxu1 }
 0x269   :  { %v444_v47 = vadd.f32 %v437_v45, %v308_v33  ;;  %v1027_v33 = vld [vmem:[%s1483_s6] ss:$0 sm:$0xff] }
 0x26a   :  { %v1135_v48 = vpop.f32.mrf.mxu1 }
 0x26b   :  { %v453_v49 = vadd.f32 %v990_v46, %v444_v47  ;;  %v1235_v48 = vmov 0  }
 0x26c   :  { %v440_v50 = vpop.f32.mrf.mxu1  ;;  %1199 = vset.pattern.permute.xlu0 %v1235_v48 }
 0x26d   :  { %v445_v51 = vadd.f32 %v440_v50, %v311_v36  ;;  %v457_v53 = vmul.f32 0.2, %v453_v49  ;;  %vm455_vm3 = vcmp.gt.f32.partialorder %v453_v49, 0.0 }
 0x26e   :  { %v1136_v52 = vpop.f32.mrf.mxu1 }
 0x26f   :  { %v454_v54 = vadd.f32 %v990_v46, %v445_v51  ;;  %v459_v56 = vsel %vm455_vm3, %v453_v49, %v457_v53  ;;  %v1029_v49 = vld [vmem:[#allocation2] ss:$0 sm:$0xff] }
 0x271   :  { %vm456_vm4 = vcmp.gt.f32.partialorder %v454_v54, 0.0  ;;  %v458_v55 = vmul.f32 0.2, %v454_v54 }
 0x273   :  { %v460_v57 = vsel %vm456_vm4, %v454_v54, %v458_v55 }
 0x274   :  { %v461_v58 = vpack.c.bf16 %v460_v57, %v459_v56 }
 0x276   :  { %1138 = vmatpush3.bf16.msra.mxu0 %v461_v58 }
 0x277   :  { %1143 = vmatprep.subr.bf16.mxu0 %v1233_v0 }
 0x279   :  { %1140 = vmatmul.mubr.msk.bf16.vlgmr.msra.gmra.mxu0 %vm463_vm5, %v462_v59 }
 0x27a   :  { %1144 = vmatpush3.bf16.msra.mxu0 %v461_v58  ;;  %1145 = vmatprep.mubr.msk.bf16.mxu0 %vm1234_vm0, %v1233_v0 }
 0x27b   :  { %1161 = vmatprep.subr.bf16.mxu0 %v1233_v0 }
 0x281   :  { %1146 = vmatmul.mubr.msk.bf16.vlgmr.msra.gmra.mxu0 %vm463_vm5, %v992_v60 }
 0x282   :  { %1162 = vmatpush3.bf16.msra.mxu0 %v1217_v61  ;;  %1169 = vmatprep.mubr.msk.bf16.mxu0 %vm1234_vm0, %v1233_v0 }
 0x283   :  { %1163 = vmatprep.subr.bf16.mxu0 %v1233_v0 }
 0x286   :  { %1164 = vmatpush3.bf16.msra.mxu0 %v1218_v62 }
 0x287   :  { %1165 = vmatprep.subr.bf16.mxu0 %v1233_v0 }
 0x28a   :  { %1166 = vmatpush3.bf16.msra.mxu0 %v1220_v63 }
 0x28b   :  { %1167 = vmatprep.subr.bf16.mxu0 %v1233_v0 }
 0x28e   :  { %1168 = vmatpush3.bf16.msra.mxu0 %v1222_v1 }
 0x28f   :  { %1179 = vmatprep.subr.bf16.mxu0 %v1233_v0 }
 0x339   :  { %v501_v4 = vpop.f32.mrf.mxu0 }
 0x33a   :  { %v507_v5 = vpack.c.bf16 %v501_v4, %v501_v4 }
 0x33b   :  { %v1141_v6 = vpop.f32.mrf.mxu0 }
 0x33c   :  { %1170 = vmatmul.mubr.msk.bf16.vlgmr.msra.gmra.mxu0 %vm201_vm2, %v507_v5 }
 0x33d   :  { %v504_v7 = vpop.f32.mrf.mxu0  ;;  %1187 = vmatprep.mubr.msk.bf16.mxu0 %vm1234_vm0, %v1233_v0  ;;  %1180 = vmatpush3.bf16.msra.mxu0 %v1225_v15 }
 0x33e   :  { %1181 = vmatprep.subr.bf16.mxu0 %v1233_v0 }
 0x33f   :  { %v1142_v8 = vpop.f32.mrf.mxu0 }
 0x341   :  { %v555_v9 = vpop.f32.mrf.mxu0  ;;  %1182 = vmatpush3.bf16.msra.mxu0 %v1226_v16 }
 0x342   :  { %v561_v10 = vpack.c.bf16 %v555_v9, %v555_v9  ;;  %1183 = vmatprep.subr.bf16.mxu0 %v1233_v0 }
 0x343   :  { %v1147_v11 = vpop.f32.mrf.mxu0 }
 0x344   :  { %1158 = vmatmul.mubr.msk.bf16.vlgmr.msra.gmra.mxu1 %vm201_vm2, %v561_v10 }
 0x345   :  { %1174 = vmatpush3.bf16.msra.mxu1 %v461_v58  ;;  %v558_v12 = vpop.f32.mrf.mxu0  ;;  %1175 = vmatprep.mubr.msk.bf16.mxu1 %vm1234_vm0, %v1233_v0 }
 0x346   :  { %1191 = vmatprep.subr.mxu1 %v1233_v0  ;;  %1184 = vmatpush3.bf16.msra.mxu0 %v1227_v17 }
 0x347   :  { %v1148_v13 = vpop.f32.mrf.mxu0  ;;  %1185 = vmatprep.subr.bf16.mxu0 %v1233_v0 }
 0x34a   :  { %1186 = vmatpush3.bf16.msra.mxu0 %v1228_v18 }
 0x34c   :  { %1176 = vmatmul.mubr.msk.bf16.vlgmr.msra.gmra.mxu1 %vm463_vm5, %v1012_v14 }
 0x34d   :  { %1193 = vmatprep.mubr.msk.f32.mxu1 %vm1234_vm0, %v1233_v0 }
 0x3fc   :  { %v699_v19 = vpop.f32.mrf.mxu0 }
 0x3fe   :  { %v1171_v20 = vpop.f32.mrf.mxu0 }
 0x400   :  { %v702_v21 = vpop.f32.mrf.mxu0 }
 0x402   :  { %v1172_v22 = vpop.f32.mrf.mxu0 }
 0x404   :  { %v632_v23 = vpop.f32.mrf.mxu1 }
 0x405   :  { %v700_v24 = vadd.f32 %v699_v19, %v632_v23 }
 0x406   :  { %v1159_v25 = vpop.f32.mrf.mxu1 }
 0x408   :  { %v635_v26 = vpop.f32.mrf.mxu1 }
 0x40a   :  { %v1160_v27 = vpop.f32.mrf.mxu1 }
 0x40c   :  { %v744_v28 = vpop.f32.mrf.mxu1 }
 0x40d   :  { %v750_v29 = vpack.c.bf16 %v744_v28, %v744_v28 }
 0x40e   :  { %v1177_v30 = vpop.f32.mrf.mxu1 }
 0x40f   :  { %1188 = vmatmul.mubr.msk.bf16.vlgmr.msra.gmra.mxu0 %vm201_vm2, %v750_v29 }
 0x410   :  { %v747_v0 = vpop.f32.mrf.mxu1 }
 0x412   :  { %v1178_v31 = vpop.f32.mrf.mxu1 }
 0x4cf   :  { %v821_v32 = vpop.f32.mrf.mxu0 }
 0x4d0   :  { %v827_v34 = vadd.f32 %v821_v32, %v700_v24 }
 0x4d1   :  { %v1189_v35 = vpop.f32.mrf.mxu0 }
 0x4d2   :  { %v835_v36 = vadd.f32 %v1027_v33, %v827_v34 }
 0x4d3   :  { %v824_v37 = vpop.f32.mrf.mxu0 }
 0x4d4   :  { %vm836_vm6 = vcmp.gt.f32.partialorder %v835_v36, 0.0  ;;  %v837_v38 = vmul.f32 0.2, %v835_v36 }
 0x4d5   :  { %v1190_v40 = vpop.f32.mrf.mxu0 }
 0x4d6   :  { %v838_v41 = vsel %vm836_vm6, %v835_v36, %v837_v38 }
 0x4d7   :  { %v840_v42 = vmul.f32 %v839_v39, %v838_v41 }
 0x4d9   :  { %1192 = vmatpush3.msra.mxu1 %v840_v42 }
 0x4da   :  { %1194 = vmatmul.mubr.msk.f32.vlgmr.msra.gmra.mxu1 %vm842_vm7, %v841_v43 }
 0x59a   :  { %v912_v45 = vpop.f32.mrf.mxu1 }
 0x59b   :  { %v917_v46 = vsel %vm916_vm8, %v912_v45, 0.0 }
 0x59c   :  { %918 = vadd.xlane.f32.xlu0 %v917_v46  ;;  %v1195_v47 = vpop.f32.mrf.mxu1 }
 0x625   :  { %v919_v50 = vpop.xlane.xlu0 %918 }
 0x626   :  { %v927_v51 = vadd.f32 %v1029_v49, %v919_v50 }
 0x628   :  { %v928_v52 = vand.u32 2147483647, %v927_v51  ;;  %vm934_vm9 = vcmp.ge.f32.partialorder %v927_v51, 0.0 }
 0x62a   :  { %v929_v53 = vsub.f32 0.0, %v928_v52 }
 0x62c   :  { %v930_v54 = vmul.f32 1.442695, %v929_v53 }
 0x62e   :  { %1229 = vpow2.f32 %v930_v54 }
 0x63b   :  { %v1230_v55 = vpop.eup %1229 }
 0x63c   :  { %v932_v56 = vadd.f32 1.0, %v1230_v55 }
 0x63e   :  { %1231 = vrcp.f32 %v932_v56 }
 0x64b   :  { %v1232_v57 = vpop.eup %1231 }
 0x64c   :  { %v935_v58 = vmul.f32 %v1232_v57, %v1230_v55 }
 0x64e   :  { %v936_v59 = vsel %vm934_vm9, %v1232_v57, %v935_v58 }
 0x64f   :  { %939 = vperm.xlu0 %1199, %v936_v59  }
 0x6ca   :  { %v940_v60 = vpop.permute.xlu0 %939 }
 0x6cb   :  { %942 = vst [vmem:[%s1487_s10] sm:$0x3] %v940_v60 }

</bundles_post_ra>
